<compile_context>
chip_gen: v5e
topology: v5e:2x2
jax: 0.10.0
libtpu: 0.0.40
codegen_flags: <defaults>
</compile_context>

<pallas_src>
import jax
import jax.numpy as jnp
from jax.experimental import pallas as pl
from jax.experimental.pallas import tpu as pltpu


def _round_up(x, m):
    return ((x + m - 1) // m) * m


def _vmem_capacity_bytes():
    """Physical VMEM per TensorCore (128 MiB v5e/v6e, 64 MiB v7x)."""
    try:
        info = pltpu.get_tpu_info()
        cap = int(getattr(info, "vmem_capacity_bytes", 0) or 0)
        if cap > 0:
            return cap
    except Exception:
        pass
    return 64 << 20  # conservative fallback (v7x-sized)


def _is_v5e():
    try:
        kind = jax.devices()[0].device_kind.lower()
    except Exception:
        return False
    return ("v5 lite" in kind) or ("v5e" in kind) or ("v5litepod" in kind)


def _head_group(H, D, lane_cap=512, unroll_cap=16):
    """Heads packed per grid step (lane-dense output).

    Prefer the largest divisor G of H with G*D % 128 == 0 (unmasked wide stores);
    otherwise the widest divisor under the lane cap. When D is already a multiple
    of 128, packing buys nothing and only costs a post-kernel transpose -> G = 1.
    """
    if D % 128 == 0:
        return 1
    divisors = [g for g in range(1, H + 1)
                if H % g == 0 and g * D <= lane_cap and g <= unroll_cap]
    if not divisors:
        return 1
    mult128 = [g for g in divisors if (g * D) % 128 == 0]
    if mult128:
        return max(mult128)
    return max(divisors)


def _choose_tiles(B, L, G, K, D, x_itemsize, o_itemsize, w_itemsize,
                  budget_bytes, x_bufs=2):
    """Pick (TB, TL) so the pipelined VMEM working set fits `budget_bytes`."""
    w_bytes = 2 * (G * _round_up(K, 8) * _round_up(D, 128) * w_itemsize
                   + G * 8 * _round_up(D, 128) * 4)

    def working_set(tb, tl):
        xb = tb * G * _round_up(tl, 8) * _round_up(K, 128) * x_itemsize
        ob = tb * _round_up(tl, 8) * _round_up(G * D, 128) * o_itemsize
        return x_bufs * xb + 2 * ob + w_bytes

    # TL: divisor of L, sublane friendly (multiple of 8) unless it is the full dim.
    tl_cands = [d for d in range(min(L, 4096), 0, -1)
                if L % d == 0 and (d == L or d % 8 == 0)]
    if not tl_cands:
        # TODO(synk): pad L to a friendly multiple (pl.cdiv grid + pl.when masking)
        # for pathological lengths instead of falling back to a full-L tile.
        tl_cands = [L]
    TL = next((d for d in tl_cands if working_set(1, d) <= budget_bytes),
              tl_cands[-1])

    # TB: grow only after TL is maxed out (M = TL carries the MXU work); small cap
    # keeps the static in-kernel unroll (TB * G dots) bounded.
    tb_cands = [d for d in range(min(B, 8), 0, -1) if B % d == 0]
    TB = next((d for d in tb_cands if working_set(d, TL) <= budget_bytes), 1)
    return TB, TL, working_set(TB, TL)


def _grid_order(Hg, nB, nL):
    """Outermost axis must be splittable across v7x's 2 TensorCores when possible.

    Prefer head-group outermost (weights stay VMEM-resident across the whole inner
    sweep); if it cannot split two ways, promote a batch or sequence tile axis and
    keep head-group as the next axis (weight re-loads stay cheap: the per-group
    weight block is tiny vs. the streamed activations).
    """
    def splits(n):
        return n >= 2 and n % 2 == 0
    if splits(Hg):
        return ("hg", "b", "l")
    if splits(nB):
        return ("b", "hg", "l")
    if splits(nL):
        return ("l", "hg", "b")
    return ("hg", "b", "l")


def _make_index_maps(order):
    pos = {name: i for i, name in enumerate(order)}

    def x_map(i0, i1, i2):
        a = (i0, i1, i2)
        return (a[pos["b"]], a[pos["hg"]], a[pos["l"]], 0)

    def w_map(i0, i1, i2):
        a = (i0, i1, i2)
        return (a[pos["hg"]], 0, 0)

    def bias_map(i0, i1, i2):
        a = (i0, i1, i2)
        return (a[pos["hg"]], 0, 0)

    def o_map(i0, i1, i2):
        a = (i0, i1, i2)
        return (a[pos["b"]], a[pos["hg"]], a[pos["l"]], 0)

    return x_map, w_map, bias_map, o_map


def _compress_kernel(x_ref, w_ref, b_ref, o_ref):
    # x_ref: (TB, G, TL, K) native dtype   w_ref: (G, K, D) compute dtype
    # b_ref: (G, 1, D) f32                 o_ref: (TB, 1, TL, G*D)
    TB, G, TL, K = x_ref.shape
    compute_dtype = w_ref.dtype
    for b in range(TB):                                  # static unroll, TB <= 8
        cols = []
        for g in range(G):                               # static unroll, G <= 16
            # (TL, K) slice: last two block dims -> contiguous, no retile copy.
            xg = x_ref[b, g].astype(compute_dtype)       # in-kernel cast (free on VPU)
            yg = jnp.dot(xg, w_ref[g], preferred_element_type=jnp.float32)
            # f32 bias add, then cast BEFORE the concat (halves live f32 bytes).
            cols.append((yg + b_ref[g]).astype(o_ref.dtype))
        row = cols[0] if G == 1 else jnp.concatenate(cols, axis=-1)  # (TL, G*D)
        o_ref[b, 0] = row                                # one wide lane-dense store


def pack_conv_params(weight, bias, heads, dim_head, compress_window_size,
                     compute_dtype=jnp.bfloat16):
    """Repack PyTorch Conv1d params (out_ch, in_ch/groups, k) into (H, K, D) matmul form.

    In production, precompute this ONCE at parameter-load time (hoisted out of the
    per-call path).
    """
    H, D, C = heads, dim_head, compress_window_size
    K = C * D
    # (H*D, D, C) -> (H, Dout, Din, C) -> (H, C, Din, Dout) -> (H, K=C*D, Dout)
    w = weight.reshape(H, D, D, C).transpose(0, 3, 2, 1).reshape(H, K, D)
    return w.astype(compute_dtype), bias.reshape(H, 1, D).astype(jnp.float32)


def conv_linear_compress_packed(kv, w_packed, b_packed, heads, dim_head,
                                compress_window_size, unpack_heads=True):
    B, H, W, N, D = kv.shape
    C = compress_window_size
    assert H == heads and D == dim_head
    T = W * N
    assert T % C == 0, "total sequence length must be divisible by the window size"
    L = T // C
    K = C * D

    G = _head_group(H, D)          # heads packed per grid step -> lane-dense output
    Hg = H // G

    x_itemsize = jnp.dtype(kv.dtype).itemsize
    o_itemsize = jnp.dtype(kv.dtype).itemsize
    w_itemsize = jnp.dtype(w_packed.dtype).itemsize

    # Generation-aware VMEM budget: v5e/v6e have 128 MiB physical VMEM, v7x 64 MiB.
    cap = _vmem_capacity_bytes()
    budget = (72 << 20) if cap >= (96 << 20) else (22 << 20)

    x_bufs = 3 if _is_v5e() else 2   # v5e: triple-buffer x to hide DMA at ~0.82 TB/s
    TB, TL, ws_bytes = _choose_tiles(B, L, G, K, D, x_itemsize, o_itemsize,
                                     w_itemsize, budget, x_bufs=x_bufs)
    nB, nL = B // TB, L // TL

    # Windowed, contraction-major layout: k = c*D + din on the lane axis.
    # Pure reshape of contiguous trailing dims -> no extra HBM traffic (the old
    # wrapper-side .astype(bf16) full-array cast has been removed).
    x = kv.reshape(B, H, L, K)

    order = _grid_order(Hg, nB, nL)
    extents = {"hg": Hg, "b": nB, "l": nL}
    grid = tuple(extents[a] for a in order)
    x_map, w_map, bias_map, o_map = _make_index_maps(order)

    x_spec_kwargs = {}
    if x_bufs > 2:
        x_spec_kwargs["pipeline_mode"] = pl.Buffered(x_bufs)

    cost = pl.CostEstimate(
        flops=2 * B * H * L * K * D,
        transcendentals=0,
        bytes_accessed=int(B * H * L * K * x_itemsize
                           + w_packed.size * w_itemsize
                           + b_packed.size * 4
                           + B * H * L * D * o_itemsize),
    )
    # vmem_limit derived from the selected working set; never clamped below it.
    vmem_limit = int(min(cap, max(ws_bytes + (8 << 20), 32 << 20)))

    out = pl.pallas_call(
        _compress_kernel,
        out_shape=jax.ShapeDtypeStruct((B, Hg, L, G * D), kv.dtype),
        grid_spec=pltpu.PrefetchScalarGridSpec(
            num_scalar_prefetch=0,
            grid=grid,
            in_specs=[
                pl.BlockSpec((TB, G, TL, K), x_map, **x_spec_kwargs),
                pl.BlockSpec((G, K, D), w_map),
                pl.BlockSpec((G, 1, D), bias_map),
            ],
            out_specs=pl.BlockSpec((TB, 1, TL, G * D), o_map),
        ),
        compiler_params=pltpu.CompilerParams(
            dimension_semantics=("parallel", "parallel", "parallel"),
            vmem_limit_bytes=vmem_limit,
        ),
        cost_estimate=cost,
    )(x, w_packed, b_packed)

    if G == 1:
        return out             # already (B, H, L, D): no head-unpack transpose at all.
    if not unpack_heads:
        return out             # grouped (B, Hg, L, G*D) layout for fused consumers.
    # Un-pack head groups: (B, Hg, L, G*D) -> (B, H, L, D).
    return out.reshape(B, Hg, L, G, D).transpose(0, 1, 3, 2, 4).reshape(B, H, L, D)


def conv_linear_compress(kv, weight, bias, heads, dim_head, compress_window_size,
                         compute_dtype=jnp.bfloat16):
    w_packed, b_packed = pack_conv_params(weight, bias, heads, dim_head,
                                          compress_window_size, compute_dtype)
    return conv_linear_compress_packed(kv, w_packed, b_packed, heads, dim_head,
                                       compress_window_size)


def _reference(kv, weight, bias, heads, dim_head, C):
    B, H, W, N, D = kv.shape
    T = W * N
    L = T // C
    K = C * D
    x = kv.reshape(B, H, L, K)
    w = weight.reshape(H, D, D, C).transpose(0, 3, 2, 1).reshape(H, K, D)
    b = bias.reshape(1, H, 1, D)
    return jnp.einsum("bhlk,hkd->bhld", x, w,
                      precision=jax.lax.Precision.HIGHEST) + b


if __name__ == "__main__":
    # Small shapes consistent with the module's forward:
    # kv: (batch, heads, windows, seq-per-window, dim_head)
    B, H, W, N, D = 2, 4, 2, 8, 16
    C = 4  # compress_window_size

    key = jax.random.PRNGKey(0)
    k_kv, k_w, k_b = jax.random.split(key, 3)

    kv = jax.random.normal(k_kv, (B, H, W, N, D), dtype=jnp.float32)
    # Conv1d(groups=H) parameter shapes: weight (H*D, D, C), bias (H*D,)
    weight = jax.random.normal(k_w, (H * D, D, C), dtype=jnp.float32) * 0.05
    bias = jax.random.normal(k_b, (H * D,), dtype=jnp.float32) * 0.05

    ref = _reference(kv, weight, bias, H, D, C)

    # Full-precision path: tight check of the layout / semantics.
    out_f32 = conv_linear_compress(kv, weight, bias, H, D, C,
                                   compute_dtype=jnp.float32)
    out_f32 = jax.block_until_ready(out_f32)
    assert out_f32.shape == (B, H, (W * N) // C, D)
    assert jnp.allclose(out_f32, ref, atol=1e-4, rtol=1e-4)

    # bf16 weight / in-kernel bf16 activation path (production default).
    out_bf16 = conv_linear_compress(kv, weight, bias, H, D, C)
    out_bf16 = jax.block_until_ready(out_bf16)
    assert out_bf16.shape == (B, H, (W * N) // C, D)
    assert jnp.allclose(out_bf16, ref, atol=2e-2, rtol=2e-2)

    print("KERNEL_OK")
</pallas_src>

<mosaic_0001>
module attributes {stable_mosaic.version = 11 : i64} {
  func.func @_compress_kernel(%arg0: i32, %arg1: i32, %arg2: i32, %arg3: memref<2x4x4x64xf32, #tpu.memory_space<vmem>>, %arg4: memref<4x64x16xf32, #tpu.memory_space<vmem>>, %arg5: memref<4x1x16xf32, #tpu.memory_space<vmem>>, %arg6: memref<2x1x4x64xf32, #tpu.memory_space<vmem>>) attributes {dimension_semantics = [#tpu.dimension_semantics<parallel>, #tpu.dimension_semantics<parallel>, #tpu.dimension_semantics<parallel>], iteration_bounds = array<i64: 1, 1, 1>, scalar_prefetch = 0 : i64, scratch_operands = 0 : i64, tpu.core_type = #tpu.core_type<tc>, window_params = [{transform_indices = @transform_0, window_bounds = array<i64: 2, 4, 4, 64>}, {transform_indices = @transform_1, window_bounds = array<i64: 4, 64, 16>}, {transform_indices = @transform_2, window_bounds = array<i64: 4, 1, 16>}, {transform_indices = @transform_3, window_bounds = array<i64: 2, 1, 4, 64>}]} {
    %c0 = arith.constant 0 : index
    %c0_0 = arith.constant 0 : index
    %c0_1 = arith.constant 0 : index
    %c0_2 = arith.constant 0 : index
    %0 = vector.load %arg3[%c0, %c0_0, %c0_1, %c0_2] : memref<2x4x4x64xf32, #tpu.memory_space<vmem>>, vector<1x1x4x64xf32>
    %1 = vector.shape_cast %0 : vector<1x1x4x64xf32> to vector<4x64xf32>
    %c0_3 = arith.constant 0 : index
    %c0_4 = arith.constant 0 : index
    %c0_5 = arith.constant 0 : index
    %2 = vector.load %arg4[%c0_3, %c0_4, %c0_5] : memref<4x64x16xf32, #tpu.memory_space<vmem>>, vector<1x64x16xf32>
    %3 = vector.shape_cast %2 : vector<1x64x16xf32> to vector<64x16xf32>
    %cst = arith.constant dense<0.000000e+00> : vector<4x16xf32>
    %4 = tpu.matmul %1, %3, %cst {dimension_numbers = #tpu.dot_dimension_numbers<[1], [0], [0], [1], [0, 0, 1, 1], [], []>} : vector<4x64xf32>, vector<64x16xf32>, vector<4x16xf32> -> vector<4x16xf32>
    %c0_6 = arith.constant 0 : index
    %c0_7 = arith.constant 0 : index
    %c0_8 = arith.constant 0 : index
    %5 = vector.load %arg5[%c0_6, %c0_7, %c0_8] : memref<4x1x16xf32, #tpu.memory_space<vmem>>, vector<1x1x16xf32>
    %6 = vector.shape_cast %5 : vector<1x1x16xf32> to vector<1x16xf32>
    %7 = vector.broadcast %6 : vector<1x16xf32> to vector<4x16xf32>
    %8 = arith.addf %4, %7 : vector<4x16xf32>
    %c0_9 = arith.constant 0 : index
    %c1 = arith.constant 1 : index
    %c0_10 = arith.constant 0 : index
    %c0_11 = arith.constant 0 : index
    %9 = vector.load %arg3[%c0_9, %c1, %c0_10, %c0_11] : memref<2x4x4x64xf32, #tpu.memory_space<vmem>>, vector<1x1x4x64xf32>
    %10 = vector.shape_cast %9 : vector<1x1x4x64xf32> to vector<4x64xf32>
    %c1_12 = arith.constant 1 : index
    %c0_13 = arith.constant 0 : index
    %c0_14 = arith.constant 0 : index
    %11 = vector.load %arg4[%c1_12, %c0_13, %c0_14] : memref<4x64x16xf32, #tpu.memory_space<vmem>>, vector<1x64x16xf32>
    %12 = vector.shape_cast %11 : vector<1x64x16xf32> to vector<64x16xf32>
    %cst_15 = arith.constant dense<0.000000e+00> : vector<4x16xf32>
    %13 = tpu.matmul %10, %12, %cst_15 {dimension_numbers = #tpu.dot_dimension_numbers<[1], [0], [0], [1], [0, 0, 1, 1], [], []>} : vector<4x64xf32>, vector<64x16xf32>, vector<4x16xf32> -> vector<4x16xf32>
    %c1_16 = arith.constant 1 : index
    %c0_17 = arith.constant 0 : index
    %c0_18 = arith.constant 0 : index
    %14 = vector.load %arg5[%c1_16, %c0_17, %c0_18] : memref<4x1x16xf32, #tpu.memory_space<vmem>>, vector<1x1x16xf32>
    %15 = vector.shape_cast %14 : vector<1x1x16xf32> to vector<1x16xf32>
    %16 = vector.broadcast %15 : vector<1x16xf32> to vector<4x16xf32>
    %17 = arith.addf %13, %16 : vector<4x16xf32>
    %c0_19 = arith.constant 0 : index
    %c2 = arith.constant 2 : index
    %c0_20 = arith.constant 0 : index
    %c0_21 = arith.constant 0 : index
    %18 = vector.load %arg3[%c0_19, %c2, %c0_20, %c0_21] : memref<2x4x4x64xf32, #tpu.memory_space<vmem>>, vector<1x1x4x64xf32>
    %19 = vector.shape_cast %18 : vector<1x1x4x64xf32> to vector<4x64xf32>
    %c2_22 = arith.constant 2 : index
    %c0_23 = arith.constant 0 : index
    %c0_24 = arith.constant 0 : index
    %20 = vector.load %arg4[%c2_22, %c0_23, %c0_24] : memref<4x64x16xf32, #tpu.memory_space<vmem>>, vector<1x64x16xf32>
    %21 = vector.shape_cast %20 : vector<1x64x16xf32> to vector<64x16xf32>
    %cst_25 = arith.constant dense<0.000000e+00> : vector<4x16xf32>
    %22 = tpu.matmul %19, %21, %cst_25 {dimension_numbers = #tpu.dot_dimension_numbers<[1], [0], [0], [1], [0, 0, 1, 1], [], []>} : vector<4x64xf32>, vector<64x16xf32>, vector<4x16xf32> -> vector<4x16xf32>
    %c2_26 = arith.constant 2 : index
    %c0_27 = arith.constant 0 : index
    %c0_28 = arith.constant 0 : index
    %23 = vector.load %arg5[%c2_26, %c0_27, %c0_28] : memref<4x1x16xf32, #tpu.memory_space<vmem>>, vector<1x1x16xf32>
    %24 = vector.shape_cast %23 : vector<1x1x16xf32> to vector<1x16xf32>
    %25 = vector.broadcast %24 : vector<1x16xf32> to vector<4x16xf32>
    %26 = arith.addf %22, %25 : vector<4x16xf32>
    %c0_29 = arith.constant 0 : index
    %c3 = arith.constant 3 : index
    %c0_30 = arith.constant 0 : index
    %c0_31 = arith.constant 0 : index
    %27 = vector.load %arg3[%c0_29, %c3, %c0_30, %c0_31] : memref<2x4x4x64xf32, #tpu.memory_space<vmem>>, vector<1x1x4x64xf32>
    %28 = vector.shape_cast %27 : vector<1x1x4x64xf32> to vector<4x64xf32>
    %c3_32 = arith.constant 3 : index
    %c0_33 = arith.constant 0 : index
    %c0_34 = arith.constant 0 : index
    %29 = vector.load %arg4[%c3_32, %c0_33, %c0_34] : memref<4x64x16xf32, #tpu.memory_space<vmem>>, vector<1x64x16xf32>
    %30 = vector.shape_cast %29 : vector<1x64x16xf32> to vector<64x16xf32>
    %cst_35 = arith.constant dense<0.000000e+00> : vector<4x16xf32>
    %31 = tpu.matmul %28, %30, %cst_35 {dimension_numbers = #tpu.dot_dimension_numbers<[1], [0], [0], [1], [0, 0, 1, 1], [], []>} : vector<4x64xf32>, vector<64x16xf32>, vector<4x16xf32> -> vector<4x16xf32>
    %c3_36 = arith.constant 3 : index
    %c0_37 = arith.constant 0 : index
    %c0_38 = arith.constant 0 : index
    %32 = vector.load %arg5[%c3_36, %c0_37, %c0_38] : memref<4x1x16xf32, #tpu.memory_space<vmem>>, vector<1x1x16xf32>
    %33 = vector.shape_cast %32 : vector<1x1x16xf32> to vector<1x16xf32>
    %34 = vector.broadcast %33 : vector<1x16xf32> to vector<4x16xf32>
    %35 = arith.addf %31, %34 : vector<4x16xf32>
    %36 = tpu.concatenate %8, %17, %26, %35 in 1 : vector<4x16xf32>, vector<4x16xf32>, vector<4x16xf32>, vector<4x16xf32> -> vector<4x64xf32>
    %c0_39 = arith.constant 0 : index
    %c0_40 = arith.constant 0 : index
    %c0_41 = arith.constant 0 : index
    %c0_42 = arith.constant 0 : index
    %37 = vector.load %arg6[%c0_39, %c0_40, %c0_41, %c0_42] : memref<2x1x4x64xf32, #tpu.memory_space<vmem>>, vector<1x1x4x64xf32>
    %38 = vector.shape_cast %37 : vector<1x1x4x64xf32> to vector<4x64xf32>
    %39 = vector.shape_cast %36 : vector<4x64xf32> to vector<1x1x4x64xf32>
    tpu.vector_store %arg6[%c0_39, %c0_40, %c0_41, %c0_42], %39 {strides = array<i32>} : memref<2x1x4x64xf32, #tpu.memory_space<vmem>>, vector<1x1x4x64xf32>,
    %c1_43 = arith.constant 1 : index
    %c0_44 = arith.constant 0 : index
    %c0_45 = arith.constant 0 : index
    %c0_46 = arith.constant 0 : index
    %40 = vector.load %arg3[%c1_43, %c0_44, %c0_45, %c0_46] : memref<2x4x4x64xf32, #tpu.memory_space<vmem>>, vector<1x1x4x64xf32>
    %41 = vector.shape_cast %40 : vector<1x1x4x64xf32> to vector<4x64xf32>
    %c0_47 = arith.constant 0 : index
    %c0_48 = arith.constant 0 : index
    %c0_49 = arith.constant 0 : index
    %42 = vector.load %arg4[%c0_47, %c0_48, %c0_49] : memref<4x64x16xf32, #tpu.memory_space<vmem>>, vector<1x64x16xf32>
    %43 = vector.shape_cast %42 : vector<1x64x16xf32> to vector<64x16xf32>
    %cst_50 = arith.constant dense<0.000000e+00> : vector<4x16xf32>
    %44 = tpu.matmul %41, %43, %cst_50 {dimension_numbers = #tpu.dot_dimension_numbers<[1], [0], [0], [1], [0, 0, 1, 1], [], []>} : vector<4x64xf32>, vector<64x16xf32>, vector<4x16xf32> -> vector<4x16xf32>
    %c0_51 = arith.constant 0 : index
    %c0_52 = arith.constant 0 : index
    %c0_53 = arith.constant 0 : index
    %45 = vector.load %arg5[%c0_51, %c0_52, %c0_53] : memref<4x1x16xf32, #tpu.memory_space<vmem>>, vector<1x1x16xf32>
    %46 = vector.shape_cast %45 : vector<1x1x16xf32> to vector<1x16xf32>
    %47 = vector.broadcast %46 : vector<1x16xf32> to vector<4x16xf32>
    %48 = arith.addf %44, %47 : vector<4x16xf32>
    %c1_54 = arith.constant 1 : index
    %c1_55 = arith.constant 1 : index
    %c0_56 = arith.constant 0 : index
    %c0_57 = arith.constant 0 : index
    %49 = vector.load %arg3[%c1_54, %c1_55, %c0_56, %c0_57] : memref<2x4x4x64xf32, #tpu.memory_space<vmem>>, vector<1x1x4x64xf32>
    %50 = vector.shape_cast %49 : vector<1x1x4x64xf32> to vector<4x64xf32>
    %c1_58 = arith.constant 1 : index
    %c0_59 = arith.constant 0 : index
    %c0_60 = arith.constant 0 : index
    %51 = vector.load %arg4[%c1_58, %c0_59, %c0_60] : memref<4x64x16xf32, #tpu.memory_space<vmem>>, vector<1x64x16xf32>
    %52 = vector.shape_cast %51 : vector<1x64x16xf32> to vector<64x16xf32>
    %cst_61 = arith.constant dense<0.000000e+00> : vector<4x16xf32>
    %53 = tpu.matmul %50, %52, %cst_61 {dimension_numbers = #tpu.dot_dimension_numbers<[1], [0], [0], [1], [0, 0, 1, 1], [], []>} : vector<4x64xf32>, vector<64x16xf32>, vector<4x16xf32> -> vector<4x16xf32>
    %c1_62 = arith.constant 1 : index
    %c0_63 = arith.constant 0 : index
    %c0_64 = arith.constant 0 : index
    %54 = vector.load %arg5[%c1_62, %c0_63, %c0_64] : memref<4x1x16xf32, #tpu.memory_space<vmem>>, vector<1x1x16xf32>
    %55 = vector.shape_cast %54 : vector<1x1x16xf32> to vector<1x16xf32>
    %56 = vector.broadcast %55 : vector<1x16xf32> to vector<4x16xf32>
    %57 = arith.addf %53, %56 : vector<4x16xf32>
    %c1_65 = arith.constant 1 : index
    %c2_66 = arith.constant 2 : index
    %c0_67 = arith.constant 0 : index
    %c0_68 = arith.constant 0 : index
    %58 = vector.load %arg3[%c1_65, %c2_66, %c0_67, %c0_68] : memref<2x4x4x64xf32, #tpu.memory_space<vmem>>, vector<1x1x4x64xf32>
    %59 = vector.shape_cast %58 : vector<1x1x4x64xf32> to vector<4x64xf32>
    %c2_69 = arith.constant 2 : index
    %c0_70 = arith.constant 0 : index
    %c0_71 = arith.constant 0 : index
    %60 = vector.load %arg4[%c2_69, %c0_70, %c0_71] : memref<4x64x16xf32, #tpu.memory_space<vmem>>, vector<1x64x16xf32>
    %61 = vector.shape_cast %60 : vector<1x64x16xf32> to vector<64x16xf32>
    %cst_72 = arith.constant dense<0.000000e+00> : vector<4x16xf32>
    %62 = tpu.matmul %59, %61, %cst_72 {dimension_numbers = #tpu.dot_dimension_numbers<[1], [0], [0], [1], [0, 0, 1, 1], [], []>} : vector<4x64xf32>, vector<64x16xf32>, vector<4x16xf32> -> vector<4x16xf32>
    %c2_73 = arith.constant 2 : index
    %c0_74 = arith.constant 0 : index
    %c0_75 = arith.constant 0 : index
    %63 = vector.load %arg5[%c2_73, %c0_74, %c0_75] : memref<4x1x16xf32, #tpu.memory_space<vmem>>, vector<1x1x16xf32>
    %64 = vector.shape_cast %63 : vector<1x1x16xf32> to vector<1x16xf32>
    %65 = vector.broadcast %64 : vector<1x16xf32> to vector<4x16xf32>
    %66 = arith.addf %62, %65 : vector<4x16xf32>
    %c1_76 = arith.constant 1 : index
    %c3_77 = arith.constant 3 : index
    %c0_78 = arith.constant 0 : index
    %c0_79 = arith.constant 0 : index
    %67 = vector.load %arg3[%c1_76, %c3_77, %c0_78, %c0_79] : memref<2x4x4x64xf32, #tpu.memory_space<vmem>>, vector<1x1x4x64xf32>
    %68 = vector.shape_cast %67 : vector<1x1x4x64xf32> to vector<4x64xf32>
    %c3_80 = arith.constant 3 : index
    %c0_81 = arith.constant 0 : index
    %c0_82 = arith.constant 0 : index
    %69 = vector.load %arg4[%c3_80, %c0_81, %c0_82] : memref<4x64x16xf32, #tpu.memory_space<vmem>>, vector<1x64x16xf32>
    %70 = vector.shape_cast %69 : vector<1x64x16xf32> to vector<64x16xf32>
    %cst_83 = arith.constant dense<0.000000e+00> : vector<4x16xf32>
    %71 = tpu.matmul %68, %70, %cst_83 {dimension_numbers = #tpu.dot_dimension_numbers<[1], [0], [0], [1], [0, 0, 1, 1], [], []>} : vector<4x64xf32>, vector<64x16xf32>, vector<4x16xf32> -> vector<4x16xf32>
    %c3_84 = arith.constant 3 : index
    %c0_85 = arith.constant 0 : index
    %c0_86 = arith.constant 0 : index
    %72 = vector.load %arg5[%c3_84, %c0_85, %c0_86] : memref<4x1x16xf32, #tpu.memory_space<vmem>>, vector<1x1x16xf32>
    %73 = vector.shape_cast %72 : vector<1x1x16xf32> to vector<1x16xf32>
    %74 = vector.broadcast %73 : vector<1x16xf32> to vector<4x16xf32>
    %75 = arith.addf %71, %74 : vector<4x16xf32>
    %76 = tpu.concatenate %48, %57, %66, %75 in 1 : vector<4x16xf32>, vector<4x16xf32>, vector<4x16xf32>, vector<4x16xf32> -> vector<4x64xf32>
    %c1_87 = arith.constant 1 : index
    %c0_88 = arith.constant 0 : index
    %c0_89 = arith.constant 0 : index
    %c0_90 = arith.constant 0 : index
    %77 = vector.load %arg6[%c1_87, %c0_88, %c0_89, %c0_90] : memref<2x1x4x64xf32, #tpu.memory_space<vmem>>, vector<1x1x4x64xf32>
    %78 = vector.shape_cast %77 : vector<1x1x4x64xf32> to vector<4x64xf32>
    %79 = vector.shape_cast %76 : vector<4x64xf32> to vector<1x1x4x64xf32>
    tpu.vector_store %arg6[%c1_87, %c0_88, %c0_89, %c0_90], %79 {strides = array<i32>} : memref<2x1x4x64xf32, #tpu.memory_space<vmem>>, vector<1x1x4x64xf32>,
    return
  }
  func.func @transform_0(%arg0: i32, %arg1: i32, %arg2: i32) -> (i32, i32, i32, i32) {
    %c0_i32 = arith.constant 0 : i32
    %c0_i32_0 = arith.constant 0 : i32
    return %arg1, %arg0, %arg2, %c0_i32 : i32, i32, i32, i32
  }
  func.func @transform_1(%arg0: i32, %arg1: i32, %arg2: i32) -> (i32, i32, i32) {
    %c0_i32 = arith.constant 0 : i32
    %c0_i32_0 = arith.constant 0 : i32
    %c0_i32_1 = arith.constant 0 : i32
    return %arg0, %c0_i32, %c0_i32_0 : i32, i32, i32
  }
  func.func @transform_2(%arg0: i32, %arg1: i32, %arg2: i32) -> (i32, i32, i32) {
    %c0_i32 = arith.constant 0 : i32
    %c0_i32_0 = arith.constant 0 : i32
    %c0_i32_1 = arith.constant 0 : i32
    return %arg0, %c0_i32, %c0_i32_0 : i32, i32, i32
  }
  func.func @transform_3(%arg0: i32, %arg1: i32, %arg2: i32) -> (i32, i32, i32, i32) {
    %c0_i32 = arith.constant 0 : i32
    %c0_i32_0 = arith.constant 0 : i32
    return %arg1, %arg0, %arg2, %c0_i32 : i32, i32, i32, i32
  }
}

</mosaic_0001>

<bundles_post_ra>
// kernel: tpu_custom_call.1
= control target key start
LH: loop header
LB: loop body
LE: loop exit
PB: predicated region body
PF: predicated region fallthrough
CT: control target
= control target key end

     0   :  { %vm28_vm0 = vcmask 523264   ;;  %s686_s0 = inlined_call_operand.vmem [shape: f32[2,4,4,64], index: 0, kind: input, shape index: {}]   ;;  %s687_s1 = inlined_call_operand.vmem [shape: f32[4,64,16], index: 1, kind: input, shape index: {}]   ;;  %s688_s2 = inlined_call_operand.vmem [shape: f32[4,1,16], index: 2, kind: input, shape index: {}]   ;;  %s689_s3 = inlined_call_operand.hbm [shape: f32[2,1,4,64], index: 3, kind: output, shape index: {}]  }
   0x1   :  { %v392_v0 = vld [vmem:[%s687_s1 + $0xb8] sm:$0xff]  ;;  %v391_v1 = vld [vmem:[%s687_s1 + $0xb0] sm:$0xff]  ;;  %v390_v4 = vld [vmem:[%s687_s1 + $0xa8] sm:$0xff] }
   0x2   :  { %118 = vmatpush.msra.mxu2 %v392_v0  ;;  %v381_v2 = vld [vmem:[%s687_s1 + $0x78] sm:$0xff]  ;;  %v380_v3 = vld [vmem:[%s687_s1 + $0x70] sm:$0xff]  ;;  %v379_v5 = vld [vmem:[%s687_s1 + $0x68] sm:$0xff] }
   0x3   :  { %79 = vmatpush.msra.mxu1 %v381_v2  ;;  %v389_v6 = vld [vmem:[%s687_s1 + $0xa0] sm:$0xff]  ;;  %v403_v8 = vld [vmem:[%s687_s1 + $0xf8] sm:$0xff]  ;;  %v402_v10 = vld [vmem:[%s687_s1 + $0xf0] sm:$0xff] }
   0x4   :  { %119 = vmatpush.msra.mxu2 %v391_v1  ;;  %v378_v7 = vld [vmem:[%s687_s1 + $0x60] sm:$0xff]  ;;  %v388_v9 = vld [vmem:[%s687_s1 + $0x98] sm:$0xff]  ;;  %157 = vmatpush.msra.mxu3 %v403_v8  ;;  %v546_v12 = vld [vmem:[%s687_s1 + $0xe8] sm:$0xff] }
   0x5   :  { %80 = vmatpush.msra.mxu1 %v380_v3  ;;  %v377_v11 = vld [vmem:[%s687_s1 + $0x58] sm:$0xff]  ;;  %v387_v13 = vld [vmem:[%s687_s1 + $0x90] sm:$0xff]  ;;  %v557_v15 = vld [vmem:[%s687_s1 + $0xe0] sm:$0xff] }
   0x6   :  { %120 = vmatpush.msra.mxu2 %v390_v4  ;;  %158 = vmatpush.msra.mxu3 %v402_v10  ;;  %v376_v14 = vld [vmem:[%s687_s1 + $0x50] sm:$0xff]  ;;  %v386_v16 = vld [vmem:[%s687_s1 + $0x88] sm:$0xff]  ;;  %v566_v17 = vld [vmem:[%s687_s1 + $0x38] sm:$0xff] }
   0x7   :  { %81 = vmatpush.msra.mxu1 %v379_v5  ;;  %v571_v18 = vld [vmem:[%s687_s1 + $0x30] sm:$0xff]  ;;  %v385_v19 = vld [vmem:[%s687_s1 + $0x80] sm:$0xff]  ;;  %v375_v20 = vld [vmem:[%s687_s1 + $0x48] sm:$0xff]  ;;  %40 = vmatpush.msra.mxu0 %v566_v17 }
   0x8   :  { %121 = vmatpush.msra.mxu2 %v389_v6  ;;  %159 = vmatpush.msra.mxu3 %v546_v12  ;;  %v399_v21 = vld [vmem:[%s687_s1 + $0xd8] sm:$0xff]  ;;  %v374_v22 = vld [vmem:[%s687_s1 + $0x40] sm:$0xff]  ;;  %v384_v23 = vld [vmem:[%s686_s0 + $0x8] sm:$0xf] }
   0x9   :  { %82 = vmatpush.msra.mxu1 %v378_v7  ;;  %v21_v24 = vld [vmem:[%s687_s1 + $0x28] sm:$0xff]  ;;  %v373_v25 = vld [vmem:[%s686_s0 + $0x4] sm:$0xf]  ;;  %41 = vmatpush.msra.mxu0 %v571_v18 }
   0xa   :  { %122 = vmatpush.msra.mxu2 %v388_v9  ;;  %160 = vmatpush.msra.mxu3 %v557_v15 }
   0xb   :  { %83 = vmatpush.msra.mxu1 %v377_v11  ;;  %42 = vmatpush.msra.mxu0 %v21_v24 }
   0xc   :  { %123 = vmatpush.msra.mxu2 %v387_v13  ;;  %161 = vmatpush.msra.mxu3 %v399_v21 }
   0xd   :  { %84 = vmatpush.msra.mxu1 %v376_v14 }
   0xe   :  { %124 = vmatpush.msra.mxu2 %v386_v16 }
   0xf   :  { %85 = vmatpush.msra.mxu1 %v375_v20 }
  0x10   :  { %125 = vmatpush.msra.mxu2 %v385_v19 }
  0x11   :  { %8 = vsyncpa [#allocation3], 0  ;;  %86 = vmatpush.msra.mxu1 %v374_v22  ;;  %v398_v26 = vld [vmem:[%s687_s1 + $0xd0] sm:$0xff]  ;;  %394 = vmatmul.msk.f32.vlgmr.msra.gmra.mxu2 %vm28_vm0, %v384_v23  ;;  %v20_v27 = vld [vmem:[%s687_s1 + $0x20] sm:$0xff]  ;;  %s481_s14 = smov 16   ;;  %s482_s15 = smov 32  }
  0x12   :  { %288 = vmatpush.msrb.mxu2 %v392_v0  ;;  %383 = vmatmul.msk.f32.vlgmr.msra.gmra.mxu1 %vm28_vm0, %v373_v25  ;;  %v397_v28 = vld [vmem:[%s687_s1 + $0xc8] sm:$0xff]  ;;  %v19_v29 = vld [vmem:[%s687_s1 + $0x18] sm:$0xff]  ;;  %v396_v30 = vld [vmem:[%s687_s1 + $0xc0] sm:$0xff]  ;;  %s483_s21 = smov 48   ;;  %vm181_vm1 = vcmask 130048   ;;  %vm183_vm2 = vcmask 261120  }
  0x13   :  { %251 = vmatpush.msrb.mxu1 %v381_v2  ;;  %162 = vmatpush.msra.mxu3 %v398_v26  ;;  %v395_v31 = vld [vmem:[%s686_s0 + $0xc] sm:$0xf]  ;;  %v18_v32 = vld [vmem:[%s687_s1 + $0x10] sm:$0xff]  ;;  %v419_v34 = vld [vmem:[%s686_s0 + $0x18] sm:$0xf]  ;;  %vm185_vm3 = vcmask 392192  }
  0x14   :  { %289 = vmatpush.msrb.mxu2 %v391_v1  ;;  %43 = vmatpush.msra.mxu0 %v20_v27  ;;  %v17_v33 = vld [vmem:[%s687_s1 + $0x8] sm:$0xff]  ;;  %v408_v35 = vld [vmem:[%s686_s0 + $0x14] sm:$0xf]  ;;  %v16_v36 = vld [vmem:[%s687_s1] sm:$0xff]  ;;  %vm187_vm4 = vcmask 519168   ;;  %s484_s28 = smov [#allocation2]  }
  0x15   :  { %252 = vmatpush.msrb.mxu1 %v380_v3  ;;  %163 = vmatpush.msra.mxu3 %v397_v28  ;;  %v15_v37 = vld [vmem:[%s686_s0] sm:$0xf]  ;;  %v430_v38 = vld [vmem:[%s686_s0 + $0x1c] sm:$0xf]  ;;  %v406_v39 = vld [vmem:[%s686_s0 + $0x10] sm:$0xf] }
  0x16   :  { %290 = vmatpush.msrb.mxu2 %v390_v4  ;;  %44 = vmatpush.msra.mxu0 %v19_v29  ;;  %v447_v40 = vld [vmem:[%s688_s2 + $0x1] ss:$0 sm:$0xff]  ;;  %v448_v43 = vld [vmem:[%s688_s2 + $0x2] ss:$0 sm:$0xff]  ;;  %v451_v46 = vld [vmem:[%s688_s2 + $0x3] ss:$0 sm:$0xff] }
  0x17   :  { %253 = vmatpush.msrb.mxu1 %v379_v5  ;;  %164 = vmatpush.msra.mxu3 %v396_v30  ;;  %v449_v47 = vld [vmem:[%s688_s2 + $0x1] ss:$0 sm:$0xff]  ;;  %v450_v52 = vld [vmem:[%s688_s2 + $0x2] ss:$0 sm:$0xff]  ;;  %v452_v55 = vld [vmem:[%s688_s2 + $0x3] ss:$0 sm:$0xff] }
  0x18   :  { %291 = vmatpush.msrb.mxu2 %v389_v6  ;;  %405 = vmatmul.msk.f32.vlgmr.msra.gmra.mxu3 %vm28_vm0, %v395_v31  ;;  %v453_v58 = vld [vmem:[%s688_s2] ss:$0 sm:$0xff]  ;;  %s358_s29 = sshll.u32 %s484_s28, 4  ;;  %s360_s5 = sshll.u32 %s689_s3, 4  ;;  %s359_s29 = int_to_ptr.vmem [resolvable:$true] %s358_s29  ;;  %s361_s5 = int_to_ptr.hbm [resolvable:$true] %s360_s5 }
  0x19   :  { %254 = vmatpush.msrb.mxu1 %v378_v7  ;;  %325 = vmatpush.msrb.mxu3 %v403_v8  ;;  %v454_v3 = vld [vmem:[%s688_s2] ss:$0 sm:$0xff]  ;;  %s485_s2 = smov 64   ;;  %s486_s6 = smov 4  }
  0x1a   :  { %292 = vmatpush.msrb.mxu2 %v388_v9  ;;  %45 = vmatpush.msra.mxu0 %v18_v32 }
  0x1b   :  { %255 = vmatpush.msrb.mxu1 %v377_v11  ;;  %326 = vmatpush.msrb.mxu3 %v402_v10 }
  0x1c   :  { %293 = vmatpush.msrb.mxu2 %v387_v13  ;;  %46 = vmatpush.msra.mxu0 %v17_v33 }
  0x1d   :  { %256 = vmatpush.msrb.mxu1 %v376_v14  ;;  %327 = vmatpush.msrb.mxu3 %v546_v12 }
  0x1e   :  { %294 = vmatpush.msrb.mxu2 %v386_v16  ;;  %47 = vmatpush.msra.mxu0 %v16_v36 }
  0x1f   :  { %257 = vmatpush.msrb.mxu1 %v375_v20  ;;  %328 = vmatpush.msrb.mxu3 %v557_v15 }
  0x20   :  { %295 = vmatpush.msrb.mxu2 %v385_v19  ;;  %214 = vmatpush.msrb.mxu0 %v566_v17 }
  0x21   :  { %429 = vmatmul.msk.f32.vlgmr.msrb.gmra.mxu2 %vm28_vm0, %v419_v34  ;;  %258 = vmatpush.msrb.mxu1 %v374_v22 }
  0x22   :  { %418 = vmatmul.msk.f32.vlgmr.msrb.gmra.mxu1 %vm28_vm0, %v408_v35  ;;  %329 = vmatpush.msrb.mxu3 %v399_v21 }
  0x23   :  { %372 = vmatmul.msk.f32.vlgmr.msra.gmra.mxu0 %vm28_vm0, %v15_v37 }
  0x24   :  { %330 = vmatpush.msrb.mxu3 %v398_v26  ;;  %215 = vmatpush.msrb.mxu0 %v571_v18 }
  0x26   :  { %331 = vmatpush.msrb.mxu3 %v397_v28  ;;  %216 = vmatpush.msrb.mxu0 %v21_v24 }
  0x28   :  { %332 = vmatpush.msrb.mxu3 %v396_v30  ;;  %217 = vmatpush.msrb.mxu0 %v20_v27 }
  0x29   :  { %440 = vmatmul.msk.f32.vlgmr.msrb.gmra.mxu3 %vm28_vm0, %v430_v38 }
  0x2a   :  { %218 = vmatpush.msrb.mxu0 %v19_v29 }
  0x2c   :  { %219 = vmatpush.msrb.mxu0 %v18_v32 }
  0x2e   :  { %220 = vmatpush.msrb.mxu0 %v17_v33 }
  0x30   :  { %221 = vmatpush.msrb.mxu0 %v16_v36 }
  0x31   :  { %407 = vmatmul.msk.f32.vlgmr.msrb.gmra.mxu0 %vm28_vm0, %v406_v39 }
  0x8f   :  { %v88_v41 = vpop.f32.mrf.mxu1 }
  0x90   :  { %v89_v42 = vadd.f32 %v447_v40, %v88_v41 }
  0x92   :  { %170 = vrot.lane.b32.xlu0 %v89_v42, %s481_s14 }
  0x94   :  { %v127_v44 = vpop.f32.mrf.mxu2 }
  0x95   :  { %v128_v45 = vadd.f32 %v448_v43, %v127_v44 }
  0x97   :  { %174 = vrot.lane.b32.xlu1 %v128_v45, %s482_s15 }
  0x9b   :  { %v166_v48 = vpop.f32.mrf.mxu3 }
  0x9c   :  { %v167_v50 = vadd.f32 %v451_v46, %v166_v48 }
  0x9e   :  { %178 = vrot.lane.b32.xlu2 %v167_v50, %s483_s21 }
  0x9f   :  { %v260_v49 = vpop.f32.mrf.mxu1 }
  0xa0   :  { %v261_v51 = vadd.f32 %v449_v47, %v260_v49  ;;  %v49_v59 = vpop.f32.mrf.mxu0 }
  0xa1   :  { %v50_v60 = vadd.f32 %v453_v58, %v49_v59 }
  0xa2   :  { %338 = vrot.lane.b32.xlu0 %v261_v51, %s481_s14 }
  0xa4   :  { %v297_v53 = vpop.f32.mrf.mxu2 }
  0xa5   :  { %v298_v54 = vadd.f32 %v450_v52, %v297_v53 }
  0xa7   :  { %342 = vrot.lane.b32.xlu1 %v298_v54, %s482_s15 }
  0xac   :  { %v334_v56 = vpop.f32.mrf.mxu3 }
  0xad   :  { %v335_v57 = vadd.f32 %v452_v55, %v334_v56 }
  0xae   :  { %v223_v4 = vpop.f32.mrf.mxu0 }
  0xaf   :  { %346 = vrot.lane.b32.xlu2 %v335_v57, %s483_s21  ;;  %v224_v5 = vadd.f32 %v454_v3, %v223_v4 }
  0xf8   :  { %v179_v63 = vpop.permute.xlu2 %178 }
 0x104   :  { %v171_v61 = vpop.permute.xlu0 %170 }
 0x105   :  { %v182_v62 = vsel %vm181_vm1, %v50_v60, %v171_v61 }
 0x109   :  { %v175_v0 = vpop.permute.xlu1 %174  ;;  %v347_v8 = vpop.permute.xlu2 %346 }
 0x10a   :  { %v184_v1 = vsel %vm183_vm2, %v182_v62, %v175_v0 }
 0x10b   :  { %v186_v2 = vsel %vm185_vm3, %v184_v1, %v179_v63 }
 0x10c   :  { %188 = vst.msk [vmem:[#allocation2] sm:$0xf] %vm187_vm4, %v186_v2 }
 0x114   :  { %v339_v6 = vpop.permute.xlu0 %338 }
 0x115   :  { %v349_v7 = vsel %vm181_vm1, %v224_v5, %v339_v6 }
 0x119   :  { %v343_v9 = vpop.permute.xlu1 %342 }
 0x11a   :  { %v350_v10 = vsel %vm183_vm2, %v349_v7, %v343_v9 }
 0x11b   :  { %v351_v11 = vsel %vm185_vm3, %v350_v10, %v347_v8 }
 0x11c   :  { %353 = vst.msk [vmem:[#allocation2 + $0x4] sm:$0xf] %vm187_vm4, %v351_v11 }
 0x11d   :  { %366 = dma.vmem_to_hbm [thread:$0]  %s359_s29, 128, %s361_s5, [#allocation3], %s485_s2, %s485_s2, %s486_s6  }
 0x11e   :  { %479 = dma.done.wait [#allocation3], 128  }
 0x11f   :  { %480 = vsyncadd [#allocation3], 4294967168 }
 0x120   :  { %371 = vsyncpa [#allocation3], 1 }

</bundles_post_ra>
